<compile_context>
chip_gen: v5e
topology: v5e:2x2
jax: 0.10.0
libtpu: 0.0.40
codegen_flags: <defaults>
</compile_context>

<pallas_src>
import math

import jax
import jax.numpy as jnp
from jax import lax
from jax.experimental import pallas as pl
from jax.experimental.pallas import tpu as pltpu

# Exact f32 MXU passes; irrelevant (native path) for bf16 operands.
_HP = jax.lax.Precision.HIGHEST


def _attention_head_kernel(xq_ref, xk_ref, xv_ref,
                           wq_ref, bq_ref, wk_ref, bk_ref, wv_ref, bv_ref,
                           o_ref,
                           q_scr, m_scr, l_scr, acc_scr):
    """Grid = (batch, q_tile, kv_tile); kv_tile is the innermost reduction axis.

    xq_ref : (1, TQ, Din)   query-input tile (resident across kv steps)
    xk_ref : (1, TK, Din)   key-input tile
    xv_ref : (1, TK, Din)   value-input tile
    wq_ref : (Din, Dk)  bq_ref : (1, Dk)   (1/sqrt(Dk) pre-folded)
    wk_ref : (Din, Dk)  bk_ref : (1, Dk)
    wv_ref : (Din, Dv)  bv_ref : (1, Dv)
    o_ref  : (1, TQ, Dv)
    scratch: q_scr (TQ, Dk) input dtype; m/l (TQ, 1) f32; acc (TQ, Dv) f32
    """
    ki = pl.program_id(2)

    @pl.when(ki == 0)
    def _init():
        # Project the query tile once per (batch, q-tile). The 1/sqrt(Dk)
        # scale was folded into wq/bq by the wrapper.
        q = jnp.dot(xq_ref[0], wq_ref[...], precision=_HP,
                    preferred_element_type=jnp.float32) + bq_ref[...]
        q_scr[...] = q.astype(q_scr.dtype)
        m_scr[...] = jnp.full(m_scr.shape, -jnp.inf, dtype=m_scr.dtype)
        l_scr[...] = jnp.zeros(l_scr.shape, dtype=l_scr.dtype)
        acc_scr[...] = jnp.zeros(acc_scr.shape, dtype=acc_scr.dtype)

    # Project this key/value tile (streamed over the kv grid axis).
    k = jnp.dot(xk_ref[0], wk_ref[...], precision=_HP,
                preferred_element_type=jnp.float32) + bk_ref[...]
    v = jnp.dot(xv_ref[0], wv_ref[...], precision=_HP,
                preferred_element_type=jnp.float32) + bv_ref[...]
    k = k.astype(xk_ref.dtype)   # bf16 fast path; no-op for f32 inputs
    v = v.astype(xv_ref.dtype)

    # q @ k^T without materializing a transpose (NT dot_general).
    s = lax.dot_general(q_scr[...], k, (((1,), (1,)), ((), ())),
                        precision=_HP,
                        preferred_element_type=jnp.float32)      # (TQ, TK) f32

    # Online (flash) softmax update.
    m_prev = m_scr[...]
    m_new = jnp.maximum(m_prev, jnp.max(s, axis=-1, keepdims=True))
    alpha = jnp.exp(m_prev - m_new)
    # TODO(synk): on v6e/v7x with bf16 inputs, compute exp in bf16 (EUP is the
    # saturating slot there) while keeping the denominator accumulation in f32.
    p = jnp.exp(s - m_new)
    l_scr[...] = alpha * l_scr[...] + jnp.sum(p, axis=-1, keepdims=True)
    acc_scr[...] = alpha * acc_scr[...] + jnp.dot(
        p.astype(v.dtype), v, precision=_HP,
        preferred_element_type=jnp.float32)
    m_scr[...] = m_new

    @pl.when(ki == pl.num_programs(2) - 1)
    def _finalize():
        # Exact divide (the approx reciprocal caused the prior mismatch).
        o_ref[0] = (acc_scr[...] / l_scr[...]).astype(o_ref.dtype)


def _pick_tile(n, cap=256):
    """Largest tile <= cap that divides n (sublane-aligned when possible)."""
    if n <= cap:
        return n
    for t in range(cap, 7, -8):
        if n % t == 0:
            return t
    return n


def attention_head(xq, xk, xv, wq, bq, wk, bk, wv, bv, *, tq=None, tk=None):
    """Pallas AttentionHead forward.

    xq: (B, Sq, Din); xk, xv: (B, Sk, Din)
    wq/wk: (Din, Dk), wv: (Din, Dv); bq/bk: (Dk,), bv: (Dv,)
    (Linear weights are stored pre-transposed as (dim_in, dim_out), so
    y = x @ W + b matches torch's x @ W.T + b.)
    Returns (B, Sq, Dv) in xq.dtype.
    """
    B, Sq, Din = xq.shape
    _, Sk, _ = xk.shape
    Dk = wq.shape[1]
    Dv = wv.shape[1]
    dtype = xq.dtype

    TQ = tq or _pick_tile(Sq)
    TK = tk or _pick_tile(Sk)
    assert Sq % TQ == 0 and Sk % TK == 0, "Sq/Sk must be divisible by the tiles"

    # One-time parameter prep (in a real model hoist this out of the forward):
    # fold 1/sqrt(dim_k) into the query projection and give biases a lane axis.
    scale = 1.0 / math.sqrt(Dk)
    wq_s = (wq * scale).astype(dtype)
    bq_s = (bq * scale).reshape(1, Dk).astype(dtype)
    wk_c = wk.astype(dtype)
    bk_c = bk.reshape(1, Dk).astype(dtype)
    wv_c = wv.astype(dtype)
    bv_c = bv.reshape(1, Dv).astype(dtype)

    grid = (B, Sq // TQ, Sk // TK)
    const = lambda b, qi, ki: (0, 0)

    return pl.pallas_call(
        _attention_head_kernel,
        out_shape=jax.ShapeDtypeStruct((B, Sq, Dv), dtype),
        grid=grid,
        in_specs=[
            pl.BlockSpec((1, TQ, Din), lambda b, qi, ki: (b, qi, 0)),  # xq
            pl.BlockSpec((1, TK, Din), lambda b, qi, ki: (b, ki, 0)),  # xk
            pl.BlockSpec((1, TK, Din), lambda b, qi, ki: (b, ki, 0)),  # xv
            pl.BlockSpec((Din, Dk), const),                            # wq
            pl.BlockSpec((1, Dk), const),                              # bq
            pl.BlockSpec((Din, Dk), const),                            # wk
            pl.BlockSpec((1, Dk), const),                              # bk
            pl.BlockSpec((Din, Dv), const),                            # wv
            pl.BlockSpec((1, Dv), const),                              # bv
        ],
        out_specs=pl.BlockSpec((1, TQ, Dv), lambda b, qi, ki: (b, qi, 0)),
        scratch_shapes=[
            pltpu.VMEM((TQ, Dk), dtype),        # projected, pre-scaled q tile
            pltpu.VMEM((TQ, 1), jnp.float32),   # running max
            pltpu.VMEM((TQ, 1), jnp.float32),   # running denominator
            pltpu.VMEM((TQ, Dv), jnp.float32),  # output accumulator
        ],
        compiler_params=pltpu.CompilerParams(
            dimension_semantics=("parallel", "parallel", "arbitrary")),
        # TODO(synk): pack several batch rows per step (block (TB, TQ, Din)) to
        # fill the MXU M dimension and amortize the ~0.35 us/step overhead for
        # small B; mark the grid-invariant weight specs pl.Buffered(1) and set
        # vmem_limit_bytes once Din*(2*Dk+Dv) is large enough to matter.
    )(xq, xk, xv, wq_s, bq_s, wk_c, bk_c, wv_c, bv_c)


def attention_head_ref(xq, xk, xv, wq, bq, wk, bk, wv, bv):
    """Pure-JAX reference matching the PyTorch module semantics."""
    q = jnp.matmul(xq, wq, precision=_HP) + bq
    k = jnp.matmul(xk, wk, precision=_HP) + bk
    v = jnp.matmul(xv, wv, precision=_HP) + bv
    s = jnp.einsum("bqd,bkd->bqk", q, k, precision=_HP) / math.sqrt(q.shape[-1])
    a = jax.nn.softmax(s, axis=-1)
    return jnp.einsum("bqk,bkd->bqd", a, v, precision=_HP)


if __name__ == "__main__":
    # Small shapes consistent with the module: batch=2, seq=8, dim_in=32,
    # dim_k=16, dim_v=16.  (The torch print() debug statements are omitted.)
    B, Sq, Sk, Din, Dk, Dv = 2, 8, 8, 32, 16, 16

    key = jax.random.PRNGKey(0)
    ks = jax.random.split(key, 9)
    xq = jax.random.normal(ks[0], (B, Sq, Din), dtype=jnp.float32)
    xk = jax.random.normal(ks[1], (B, Sk, Din), dtype=jnp.float32)
    xv = jax.random.normal(ks[2], (B, Sk, Din), dtype=jnp.float32)

    # Deterministic nn.Linear-style init; weights stored as (in, out).
    def lin_init(kw, kb, din, dout):
        bound = 1.0 / math.sqrt(din)
        w = jax.random.uniform(kw, (din, dout), minval=-bound, maxval=bound,
                               dtype=jnp.float32)
        b = jax.random.uniform(kb, (dout,), minval=-bound, maxval=bound,
                               dtype=jnp.float32)
        return w, b

    wq, bq = lin_init(ks[3], ks[4], Din, Dk)
    wk, bk = lin_init(ks[5], ks[6], Din, Dk)
    wv, bv = lin_init(ks[7], ks[8], Din, Dv)

    out = attention_head(xq, xk, xv, wq, bq, wk, bk, wv, bv)
    out = jax.block_until_ready(out)

    ref = attention_head_ref(xq, xk, xv, wq, bq, wk, bk, wv, bv)
    assert out.shape == (B, Sq, Dv)
    assert jnp.allclose(out, ref, atol=1e-3, rtol=1e-3), (
        f"mismatch vs reference, max abs err={jnp.max(jnp.abs(out - ref))}")

    print("KERNEL_OK")
</pallas_src>

<mosaic_0001>
module attributes {stable_mosaic.version = 11 : i64} {
  func.func @_attention_head_kernel(%arg0: i32, %arg1: i32, %arg2: i32, %arg3: memref<1x8x32xf32, #tpu.memory_space<vmem>>, %arg4: memref<1x8x32xf32, #tpu.memory_space<vmem>>, %arg5: memref<1x8x32xf32, #tpu.memory_space<vmem>>, %arg6: memref<32x16xf32, #tpu.memory_space<vmem>>, %arg7: memref<1x16xf32, #tpu.memory_space<vmem>>, %arg8: memref<32x16xf32, #tpu.memory_space<vmem>>, %arg9: memref<1x16xf32, #tpu.memory_space<vmem>>, %arg10: memref<32x16xf32, #tpu.memory_space<vmem>>, %arg11: memref<1x16xf32, #tpu.memory_space<vmem>>, %arg12: memref<1x8x16xf32, #tpu.memory_space<vmem>>, %arg13: memref<8x16xf32, #tpu.memory_space<vmem>>, %arg14: memref<8x1xf32, #tpu.memory_space<vmem>>, %arg15: memref<8x1xf32, #tpu.memory_space<vmem>>, %arg16: memref<8x16xf32, #tpu.memory_space<vmem>>) attributes {dimension_semantics = [#tpu.dimension_semantics<parallel>, #tpu.dimension_semantics<parallel>, #tpu.dimension_semantics<arbitrary>], iteration_bounds = array<i64: 2, 1, 1>, scalar_prefetch = 0 : i64, scratch_operands = 4 : i64, tpu.core_type = #tpu.core_type<tc>, window_params = [{transform_indices = @transform_0, window_bounds = array<i64: 1, 8, 32>}, {transform_indices = @transform_1, window_bounds = array<i64: 1, 8, 32>}, {transform_indices = @transform_2, window_bounds = array<i64: 1, 8, 32>}, {pipeline_mode = #tpu.pipeline_mode<synchronous>, transform_indices = @transform_3, window_bounds = array<i64: 32, 16>}, {pipeline_mode = #tpu.pipeline_mode<synchronous>, transform_indices = @transform_4, window_bounds = array<i64: 1, 16>}, {pipeline_mode = #tpu.pipeline_mode<synchronous>, transform_indices = @transform_5, window_bounds = array<i64: 32, 16>}, {pipeline_mode = #tpu.pipeline_mode<synchronous>, transform_indices = @transform_6, window_bounds = array<i64: 1, 16>}, {pipeline_mode = #tpu.pipeline_mode<synchronous>, transform_indices = @transform_7, window_bounds = array<i64: 32, 16>}, {pipeline_mode = #tpu.pipeline_mode<synchronous>, transform_indices = @transform_8, window_bounds = array<i64: 1, 16>}, {transform_indices = @transform_9, window_bounds = array<i64: 1, 8, 16>}]} {
    %c0_i32 = arith.constant 0 : i32
    %0 = arith.cmpi eq, %arg2, %c0_i32 : i32
    %1 = arith.extui %0 : i1 to i32
    %c0_i32_0 = arith.constant 0 : i32
    %2 = arith.cmpi ne, %1, %c0_i32_0 : i32
    scf.if %2 {
      %c0_35 = arith.constant 0 : index
      %c0_36 = arith.constant 0 : index
      %c0_37 = arith.constant 0 : index
      %44 = vector.load %arg3[%c0_35, %c0_36, %c0_37] : memref<1x8x32xf32, #tpu.memory_space<vmem>>, vector<1x8x32xf32>
      %45 = vector.shape_cast %44 : vector<1x8x32xf32> to vector<8x32xf32>
      %c0_38 = arith.constant 0 : index
      %c0_39 = arith.constant 0 : index
      %46 = vector.load %arg6[%c0_38, %c0_39] : memref<32x16xf32, #tpu.memory_space<vmem>>, vector<32x16xf32>
      %cst_40 = arith.constant dense<0.000000e+00> : vector<8x16xf32>
      %47 = tpu.matmul %45, %46, %cst_40 {dimension_numbers = #tpu.dot_dimension_numbers<[1], [0], [0], [1], [0, 0, 1, 1], [], []>, precision = #tpu.contract_precision<fp32>} : vector<8x32xf32>, vector<32x16xf32>, vector<8x16xf32> -> vector<8x16xf32>
      %c0_41 = arith.constant 0 : index
      %c0_42 = arith.constant 0 : index
      %48 = vector.load %arg7[%c0_41, %c0_42] : memref<1x16xf32, #tpu.memory_space<vmem>>, vector<1x16xf32>
      %49 = vector.broadcast %48 : vector<1x16xf32> to vector<8x16xf32>
      %50 = arith.addf %47, %49 : vector<8x16xf32>
      %c0_43 = arith.constant 0 : index
      %c0_44 = arith.constant 0 : index
      %51 = vector.load %arg13[%c0_43, %c0_44] : memref<8x16xf32, #tpu.memory_space<vmem>>, vector<8x16xf32>
      tpu.vector_store %arg13[%c0_43, %c0_44], %50 {strides = array<i32>} : memref<8x16xf32, #tpu.memory_space<vmem>>, vector<8x16xf32>,
      %cst_45 = arith.constant 0xFF800000 : f32
      %52 = vector.broadcast %cst_45 : f32 to vector<8x1xf32>
      %c0_46 = arith.constant 0 : index
      %c0_47 = arith.constant 0 : index
      %53 = vector.load %arg14[%c0_46, %c0_47] : memref<8x1xf32, #tpu.memory_space<vmem>>, vector<8x1xf32>
      tpu.vector_store %arg14[%c0_46, %c0_47], %52 {strides = array<i32>} : memref<8x1xf32, #tpu.memory_space<vmem>>, vector<8x1xf32>,
      %cst_48 = arith.constant 0.000000e+00 : f32
      %54 = vector.broadcast %cst_48 : f32 to vector<8x1xf32>
      %c0_49 = arith.constant 0 : index
      %c0_50 = arith.constant 0 : index
      %55 = vector.load %arg15[%c0_49, %c0_50] : memref<8x1xf32, #tpu.memory_space<vmem>>, vector<8x1xf32>
      tpu.vector_store %arg15[%c0_49, %c0_50], %54 {strides = array<i32>} : memref<8x1xf32, #tpu.memory_space<vmem>>, vector<8x1xf32>,
      %cst_51 = arith.constant 0.000000e+00 : f32
      %56 = vector.broadcast %cst_51 : f32 to vector<8x16xf32>
      %c0_52 = arith.constant 0 : index
      %c0_53 = arith.constant 0 : index
      %57 = vector.load %arg16[%c0_52, %c0_53] : memref<8x16xf32, #tpu.memory_space<vmem>>, vector<8x16xf32>
      tpu.vector_store %arg16[%c0_52, %c0_53], %56 {strides = array<i32>} : memref<8x16xf32, #tpu.memory_space<vmem>>, vector<8x16xf32>,
    } else {
    }
    %c0 = arith.constant 0 : index
    %c0_1 = arith.constant 0 : index
    %c0_2 = arith.constant 0 : index
    %3 = vector.load %arg4[%c0, %c0_1, %c0_2] : memref<1x8x32xf32, #tpu.memory_space<vmem>>, vector<1x8x32xf32>
    %4 = vector.shape_cast %3 : vector<1x8x32xf32> to vector<8x32xf32>
    %c0_3 = arith.constant 0 : index
    %c0_4 = arith.constant 0 : index
    %5 = vector.load %arg8[%c0_3, %c0_4] : memref<32x16xf32, #tpu.memory_space<vmem>>, vector<32x16xf32>
    %cst = arith.constant dense<0.000000e+00> : vector<8x16xf32>
    %6 = tpu.matmul %4, %5, %cst {dimension_numbers = #tpu.dot_dimension_numbers<[1], [0], [0], [1], [0, 0, 1, 1], [], []>, precision = #tpu.contract_precision<fp32>} : vector<8x32xf32>, vector<32x16xf32>, vector<8x16xf32> -> vector<8x16xf32>
    %c0_5 = arith.constant 0 : index
    %c0_6 = arith.constant 0 : index
    %7 = vector.load %arg9[%c0_5, %c0_6] : memref<1x16xf32, #tpu.memory_space<vmem>>, vector<1x16xf32>
    %8 = vector.broadcast %7 : vector<1x16xf32> to vector<8x16xf32>
    %9 = arith.addf %6, %8 : vector<8x16xf32>
    %c0_7 = arith.constant 0 : index
    %c0_8 = arith.constant 0 : index
    %c0_9 = arith.constant 0 : index
    %10 = vector.load %arg5[%c0_7, %c0_8, %c0_9] : memref<1x8x32xf32, #tpu.memory_space<vmem>>, vector<1x8x32xf32>
    %11 = vector.shape_cast %10 : vector<1x8x32xf32> to vector<8x32xf32>
    %c0_10 = arith.constant 0 : index
    %c0_11 = arith.constant 0 : index
    %12 = vector.load %arg10[%c0_10, %c0_11] : memref<32x16xf32, #tpu.memory_space<vmem>>, vector<32x16xf32>
    %cst_12 = arith.constant dense<0.000000e+00> : vector<8x16xf32>
    %13 = tpu.matmul %11, %12, %cst_12 {dimension_numbers = #tpu.dot_dimension_numbers<[1], [0], [0], [1], [0, 0, 1, 1], [], []>, precision = #tpu.contract_precision<fp32>} : vector<8x32xf32>, vector<32x16xf32>, vector<8x16xf32> -> vector<8x16xf32>
    %c0_13 = arith.constant 0 : index
    %c0_14 = arith.constant 0 : index
    %14 = vector.load %arg11[%c0_13, %c0_14] : memref<1x16xf32, #tpu.memory_space<vmem>>, vector<1x16xf32>
    %15 = vector.broadcast %14 : vector<1x16xf32> to vector<8x16xf32>
    %16 = arith.addf %13, %15 : vector<8x16xf32>
    %c0_15 = arith.constant 0 : index
    %c0_16 = arith.constant 0 : index
    %17 = vector.load %arg13[%c0_15, %c0_16] : memref<8x16xf32, #tpu.memory_space<vmem>>, vector<8x16xf32>
    %cst_17 = arith.constant dense<0.000000e+00> : vector<8x8xf32>
    %18 = tpu.matmul %17, %9, %cst_17 {dimension_numbers = #tpu.dot_dimension_numbers<[1], [1], [0], [0], [0, 0, 1, 0], [], []>, precision = #tpu.contract_precision<fp32>} : vector<8x16xf32>, vector<8x16xf32>, vector<8x8xf32> -> vector<8x8xf32>
    %c0_18 = arith.constant 0 : index
    %c0_19 = arith.constant 0 : index
    %19 = vector.load %arg14[%c0_18, %c0_19] : memref<8x1xf32, #tpu.memory_space<vmem>>, vector<8x1xf32>
    %cst_20 = arith.constant dense<0xFF800000> : vector<8xf32>
    %20 = vector.multi_reduction <maximumf>, %18, %cst_20 [1] : vector<8x8xf32> to vector<8xf32>
    %21 = vector.shape_cast %20 : vector<8xf32> to vector<8x1xf32>
    %22 = arith.maximumf %19, %21 : vector<8x1xf32>
    %23 = arith.subf %19, %22 : vector<8x1xf32>
    %24 = math.exp %23 : vector<8x1xf32>
    %25 = vector.broadcast %22 : vector<8x1xf32> to vector<8x8xf32>
    %26 = arith.subf %18, %25 : vector<8x8xf32>
    %27 = math.exp %26 : vector<8x8xf32>
    %c0_21 = arith.constant 0 : index
    %c0_22 = arith.constant 0 : index
    %28 = vector.load %arg15[%c0_21, %c0_22] : memref<8x1xf32, #tpu.memory_space<vmem>>, vector<8x1xf32>
    %29 = arith.mulf %24, %28 : vector<8x1xf32>
    %cst_23 = arith.constant dense<0.000000e+00> : vector<8xf32>
    %30 = vector.multi_reduction <add>, %27, %cst_23 [1] : vector<8x8xf32> to vector<8xf32>
    %31 = vector.shape_cast %30 : vector<8xf32> to vector<8x1xf32>
    %32 = arith.addf %29, %31 : vector<8x1xf32>
    %c0_24 = arith.constant 0 : index
    %c0_25 = arith.constant 0 : index
    %33 = vector.load %arg15[%c0_24, %c0_25] : memref<8x1xf32, #tpu.memory_space<vmem>>, vector<8x1xf32>
    tpu.vector_store %arg15[%c0_24, %c0_25], %32 {strides = array<i32>} : memref<8x1xf32, #tpu.memory_space<vmem>>, vector<8x1xf32>,
    %c0_26 = arith.constant 0 : index
    %c0_27 = arith.constant 0 : index
    %34 = vector.load %arg16[%c0_26, %c0_27] : memref<8x16xf32, #tpu.memory_space<vmem>>, vector<8x16xf32>
    %35 = vector.broadcast %24 : vector<8x1xf32> to vector<8x16xf32>
    %36 = arith.mulf %35, %34 : vector<8x16xf32>
    %cst_28 = arith.constant dense<0.000000e+00> : vector<8x16xf32>
    %37 = tpu.matmul %27, %16, %cst_28 {dimension_numbers = #tpu.dot_dimension_numbers<[1], [0], [0], [1], [0, 0, 1, 1], [], []>, precision = #tpu.contract_precision<fp32>} : vector<8x8xf32>, vector<8x16xf32>, vector<8x16xf32> -> vector<8x16xf32>
    %38 = arith.addf %36, %37 : vector<8x16xf32>
    %c0_29 = arith.constant 0 : index
    %c0_30 = arith.constant 0 : index
    %39 = vector.load %arg16[%c0_29, %c0_30] : memref<8x16xf32, #tpu.memory_space<vmem>>, vector<8x16xf32>
    tpu.vector_store %arg16[%c0_29, %c0_30], %38 {strides = array<i32>} : memref<8x16xf32, #tpu.memory_space<vmem>>, vector<8x16xf32>,
    %c0_31 = arith.constant 0 : index
    %c0_32 = arith.constant 0 : index
    %40 = vector.load %arg14[%c0_31, %c0_32] : memref<8x1xf32, #tpu.memory_space<vmem>>, vector<8x1xf32>
    tpu.vector_store %arg14[%c0_31, %c0_32], %22 {strides = array<i32>} : memref<8x1xf32, #tpu.memory_space<vmem>>, vector<8x1xf32>,
    %c0_i32_33 = arith.constant 0 : i32
    %41 = arith.cmpi eq, %arg2, %c0_i32_33 : i32
    %42 = arith.extui %41 : i1 to i32
    %c0_i32_34 = arith.constant 0 : i32
    %43 = arith.cmpi ne, %42, %c0_i32_34 : i32
    scf.if %43 {
      %c0_35 = arith.constant 0 : index
      %c0_36 = arith.constant 0 : index
      %44 = vector.load %arg16[%c0_35, %c0_36] : memref<8x16xf32, #tpu.memory_space<vmem>>, vector<8x16xf32>
      %c0_37 = arith.constant 0 : index
      %c0_38 = arith.constant 0 : index
      %45 = vector.load %arg15[%c0_37, %c0_38] : memref<8x1xf32, #tpu.memory_space<vmem>>, vector<8x1xf32>
      %46 = vector.broadcast %45 : vector<8x1xf32> to vector<8x16xf32>
      %47 = arith.divf %44, %46 : vector<8x16xf32>
      %c0_39 = arith.constant 0 : index
      %c0_40 = arith.constant 0 : index
      %c0_41 = arith.constant 0 : index
      %48 = vector.load %arg12[%c0_39, %c0_40, %c0_41] : memref<1x8x16xf32, #tpu.memory_space<vmem>>, vector<1x8x16xf32>
      %49 = vector.shape_cast %48 : vector<1x8x16xf32> to vector<8x16xf32>
      %50 = vector.shape_cast %47 : vector<8x16xf32> to vector<1x8x16xf32>
      tpu.vector_store %arg12[%c0_39, %c0_40, %c0_41], %50 {strides = array<i32>} : memref<1x8x16xf32, #tpu.memory_space<vmem>>, vector<1x8x16xf32>,
    } else {
    }
    return
  }
  func.func @transform_0(%arg0: i32, %arg1: i32, %arg2: i32) -> (i32, i32, i32) {
    %c0_i32 = arith.constant 0 : i32
    %c0_i32_0 = arith.constant 0 : i32
    return %arg0, %arg1, %c0_i32 : i32, i32, i32
  }
  func.func @transform_1(%arg0: i32, %arg1: i32, %arg2: i32) -> (i32, i32, i32) {
    %c0_i32 = arith.constant 0 : i32
    %c0_i32_0 = arith.constant 0 : i32
    return %arg0, %arg2, %c0_i32 : i32, i32, i32
  }
  func.func @transform_2(%arg0: i32, %arg1: i32, %arg2: i32) -> (i32, i32, i32) {
    %c0_i32 = arith.constant 0 : i32
    %c0_i32_0 = arith.constant 0 : i32
    return %arg0, %arg2, %c0_i32 : i32, i32, i32
  }
  func.func @transform_3(%arg0: i32, %arg1: i32, %arg2: i32) -> (i32, i32) {
    %c0_i32 = arith.constant 0 : i32
    %c0_i32_0 = arith.constant 0 : i32
    %c0_i32_1 = arith.constant 0 : i32
    return %c0_i32, %c0_i32_0 : i32, i32
  }
  func.func @transform_4(%arg0: i32, %arg1: i32, %arg2: i32) -> (i32, i32) {
    %c0_i32 = arith.constant 0 : i32
    %c0_i32_0 = arith.constant 0 : i32
    %c0_i32_1 = arith.constant 0 : i32
    return %c0_i32, %c0_i32_0 : i32, i32
  }
  func.func @transform_5(%arg0: i32, %arg1: i32, %arg2: i32) -> (i32, i32) {
    %c0_i32 = arith.constant 0 : i32
    %c0_i32_0 = arith.constant 0 : i32
    %c0_i32_1 = arith.constant 0 : i32
    return %c0_i32, %c0_i32_0 : i32, i32
  }
  func.func @transform_6(%arg0: i32, %arg1: i32, %arg2: i32) -> (i32, i32) {
    %c0_i32 = arith.constant 0 : i32
    %c0_i32_0 = arith.constant 0 : i32
    %c0_i32_1 = arith.constant 0 : i32
    return %c0_i32, %c0_i32_0 : i32, i32
  }
  func.func @transform_7(%arg0: i32, %arg1: i32, %arg2: i32) -> (i32, i32) {
    %c0_i32 = arith.constant 0 : i32
    %c0_i32_0 = arith.constant 0 : i32
    %c0_i32_1 = arith.constant 0 : i32
    return %c0_i32, %c0_i32_0 : i32, i32
  }
  func.func @transform_8(%arg0: i32, %arg1: i32, %arg2: i32) -> (i32, i32) {
    %c0_i32 = arith.constant 0 : i32
    %c0_i32_0 = arith.constant 0 : i32
    %c0_i32_1 = arith.constant 0 : i32
    return %c0_i32, %c0_i32_0 : i32, i32
  }
  func.func @transform_9(%arg0: i32, %arg1: i32, %arg2: i32) -> (i32, i32, i32) {
    %c0_i32 = arith.constant 0 : i32
    %c0_i32_0 = arith.constant 0 : i32
    return %arg0, %arg1, %c0_i32 : i32, i32, i32
  }
}

</mosaic_0001>

<bundles_post_ra>
// kernel: tpu_custom_call.1
= control target key start
LH: loop header
LB: loop body
LE: loop exit
PB: predicated region body
PF: predicated region fallthrough
CT: control target
= control target key end

     0   :  { %14 = vsyncpa [#allocation7], 0  ;;  %s1978_s0 = inlined_call_operand.vmem [shape: f32[2,8,32], index: 0, kind: input, shape index: {}]   ;;  %s1979_s1 = inlined_call_operand.vmem [shape: f32[2,8,32], index: 1, kind: input, shape index: {}]   ;;  %s1980_s2 = inlined_call_operand.vmem [shape: f32[2,8,32], index: 2, kind: input, shape index: {}]   ;;  %s1981_s3 = inlined_call_operand.vmem [shape: f32[32,16], index: 3, kind: input, shape index: {}]   ;;  %s1982_s4 = inlined_call_operand.vmem [shape: f32[1,16], index: 4, kind: input, shape index: {}]   ;;  %s1983_s5 = inlined_call_operand.vmem [shape: f32[32,16], index: 5, kind: input, shape index: {}]   ;;  %s1984_s6 = inlined_call_operand.vmem [shape: f32[1,16], index: 6, kind: input, shape index: {}]   ;;  %s1985_s7 = inlined_call_operand.vmem [shape: f32[32,16], index: 7, kind: input, shape index: {}]   ;;  %s1986_s8 = inlined_call_operand.vmem [shape: f32[1,16], index: 8, kind: input, shape index: {}]   ;;  %s1987_s9 = inlined_call_operand.hbm [shape: f32[2,8,16], index: 9, kind: output, shape index: {}]  }
   0x1   :  { %16 = vsyncpa [#allocation7 + $0x1], 0  ;;  %s1720_s30 = smov 0   ;;  %s1722_s10 = smov 0  }
   0x2   :  { %s1724_s11 = smov 0   ;;  %s1726_s12 = smov 0  }
   0x3   :  { %s1728_s13 = smov 0   ;;  %s1730_s14 = smov 0  }
   0x4 LB: > { %s1504_s15 = sadd.s32 4294967295, %s1665_s14   ;;  %s1505_s16 = sadd.s32 4294967294, %s1665_s14   ;;  %s1665_s14 = sphi %s1730_s14, %s22_s14   ;;  %s1661_s13 = sphi %s1728_s13, %s1994_s13   ;;  %s1657_s12 = sphi %s1726_s12, %s1993_s12   ;;  %s1653_s11 = sphi %s1724_s11, %s1992_s11   ;;  %s1649_s10 = sphi %s1722_s10, %s1991_s10   ;;  %s1645_s30 = sphi %s1720_s30, %s1990_s30  }
   0x5   : > { %s41_s17 = sadd.s32 1, %s1661_s13  ;;  %s260_s18 = sadd.s32 1, %s1653_s11 }
   0x6   : > { %p43_p0 = scmp.ge.s32.totalorder %s41_s17, 2  ;;  %p270_p1 = scmp.ne.s32.totalorder %s1653_s11, %s1649_s10 }
   0x7   : > { %p271_p2 = scmp.eq.s32.totalorder %s1504_s15, 1  ;;  %p276_p3 = scmp.ne.s32.totalorder %s1649_s10, %s1645_s30 }
   0x8   : > { %s1996_s17 = smov (%p43_p0, %s41_s17), 0  ;;  %p277_p5 = scmp.eq.s32.totalorder %s1505_s16, 1 }
   0x9   : > { %p1760_p4 = por %p271_p2, %p270_p1  ;;  %s255_s20 = ssub.s32 %s1661_s13, %s1996_s17 }
   0xa   : > { %p1508_p6 = scmp.ge.s32.totalorder %s1665_s14, 1  ;;  %p258_p7 = scmp.eq.s32.totalorder %s255_s20, 0 }
   0xb   : > { %p1767_p8 = por %p277_p5, %p276_p3  ;;  %p343_p9 = scmp.lt.s32.totalorder %s1665_s14, 3 }
   0xc   : > { %s1773_s22 = scalar_select %p258_p7, %s1653_s11, %s260_s18  }
   0xd   : > { %p344_p10 = pnand %p1508_p6, %p343_p9 }
   0xe   : > { %p395_p11 = scmp.lt.s32.totalorder (!%p344_p10), %s1657_s12, 1 }
   0xf   : > { %347 = sbr.rel (%p344_p10) target bundleno = 854 (0x356), region = 56 }
  0x14   : > { %v424_v0 = vld [vmem:[%s1981_s3 + $0x18] sm:$0xff]  ;;  %v423_v1 = vld [vmem:[%s1981_s3 + $0x10] sm:$0xff]  ;;  %v422_v2 = vld [vmem:[%s1981_s3 + $0x8] sm:$0xff]  ;;  %vm429_vm0 = vcmask 261120   ;;  %s396_s24 = scalar_select %p395_p11, %s1657_s12, 1  ;;  %vm618_vm1 = vcmask 130048  }
  0x15   : > { %v1785_v3 = vand.u32 4294901760, %v424_v0  ;;  %v1787_v4 = vand.u32 4294901760, %v423_v1  ;;  %v1789_v5 = vand.u32 4294901760, %v422_v2  ;;  %v421_v6 = vld [vmem:[%s1981_s3] sm:$0xff]  ;;  %v628_v7 = vld [vmem:[%s1983_s5 + $0x18] sm:$0xff]  ;;  %v627_v8 = vld [vmem:[%s1983_s5 + $0x10] sm:$0xff] }
  0x16   : > { %v1800_v9 = vand.u32 4294901760, %v421_v6  ;;  %v1803_v10 = vand.u32 4294901760, %v628_v7  ;;  %v1805_v11 = vand.u32 4294901760, %v627_v8  ;;  %v626_v12 = vld [vmem:[%s1983_s5 + $0x8] sm:$0xff]  ;;  %v625_v13 = vld [vmem:[%s1983_s5] sm:$0xff]  ;;  %s1823_s29 = sshll.u32 %s396_s24, 3 }
  0x17   : > { %v475_v14 = vsub.f32 %v424_v0, %v1785_v3  ;;  %446 = vmatpush.msra.mxu0 %v1785_v3  ;;  %v481_v15 = vsub.f32 %v423_v1, %v1787_v4  ;;  %546 = vmatpush.msra.mxu3 %v1785_v3  ;;  %v487_v16 = vsub.f32 %v422_v2, %v1789_v5  ;;  %v1818_v17 = vand.u32 4294901760, %v626_v12  ;;  %s401_s18 = scalar_lea.vmem %s1978_s0, %s1823_s29  ;;  %s408_s24 = scalar_lea.vmem %s1979_s1, %s1823_s29  ;;  %v826_v62 = vld [vmem:[%s1985_s7 + $0x18] sm:$0xff]  ;;  %v825_v0 = vld [vmem:[%s1985_s7 + $0x10] sm:$0xff] }
  0x18   : > { %v1821_v18 = vsub.f32 %v421_v6, %v1800_v9  ;;  %v1826_v19 = vsub.f32 %v628_v7, %v1803_v10  ;;  %v1829_v20 = vsub.f32 %v627_v8, %v1805_v11  ;;  %v1831_v21 = vand.u32 4294901760, %v625_v13  ;;  %v420_v26 = vld [vmem:[%s401_s18] sm:$0xff]  ;;  %s415_s23 = scalar_lea.vmem %s1980_s2, %s1823_s29  ;;  %s392_s18 = sand.u32 1, %s1649_s10  }
  0x19   : > { %517 = vmatpush.msra.mxu2 %v475_v14  ;;  %448 = vmatpush.msra.mxu0 %v1787_v4  ;;  %v476_v22 = vand.u32 4294901760, %v475_v14  ;;  %v482_v23 = vand.u32 4294901760, %v481_v15  ;;  %v488_v24 = vand.u32 4294901760, %v487_v16  ;;  %v1843_v25 = vsub.f32 %v626_v12, %v1818_v17  ;;  %v624_v27 = vld [vmem:[%s408_s24] sm:$0xff]  ;;  %s1509_s20 = sshll.u32 %s392_s18, 3  ;;  %s1607_s24 = scalar_lea.hbm %s1987_s9, 16 }
  0x1a   : > { %548 = vmatpush.msra.mxu3 %v1787_v4  ;;  %v494_v28 = vand.u32 4294901760, %v1821_v18  ;;  %v680_v29 = vand.u32 4294901760, %v1826_v19  ;;  %v686_v30 = vand.u32 4294901760, %v1829_v20  ;;  %v1850_v31 = vsub.f32 %v625_v13, %v1831_v21  ;;  %v823_v7 = vld [vmem:[%s1985_s7] sm:$0xff]  ;;  %s394_s26 = scalar_lea.vmem [#allocation6], %s1509_s20 }
  0x1b   : > { %520 = vmatpush.msra.mxu2 %v481_v15  ;;  %v477_v32 = vsub.f32 %v475_v14, %v476_v22  ;;  %450 = vmatpush.msra.mxu0 %v1789_v5  ;;  %v483_v33 = vsub.f32 %v481_v15, %v482_v23  ;;  %v431_v34 = vsel %vm429_vm0, %v420_v26, 0  ;;  %v635_v35 = vsel %vm429_vm0, %v624_v27, 0  ;;  %v822_v12 = vld [vmem:[%s415_s23] sm:$0xff]  ;;  %s1514_s23 = sshll.u32 %s1657_s12, 3  ;;  %s1397_s27 = sshll.u32 %s394_s26, 4  ;;  %s1398_s27 = int_to_ptr.vmem [resolvable:$true] %s1397_s27 }
  0x1c   : > { %550 = vmatpush.msra.mxu3 %v1789_v5  ;;  %v453_v36 = vand.u32 4294901760, %v431_v34  ;;  %v1856_v37 = vand.u32 4294901760, %v635_v35  ;;  %v489_v38 = vsub.f32 %v487_v16, %v488_v24  ;;  %v495_v41 = vsub.f32 %v1821_v18, %v494_v28  ;;  %s1395_s29 = scalar_lea.hbm %s1987_s9, %s1514_s23  ;;  %s1384_s12 = scalar_lea.sflag [#allocation7], %s392_s18 }
  0x1d   : > { %v478_v39 = vand.u32 4294901760, %v477_v32  ;;  %523 = vmatpush.msra.mxu2 %v487_v16  ;;  %v484_v40 = vand.u32 4294901760, %v483_v33  ;;  %452 = vmatpush.msra.mxu0 %v1800_v9  ;;  %v681_v42 = vsub.f32 %v1826_v19, %v680_v29  ;;  %v692_v44 = vand.u32 4294901760, %v1843_v25  ;;  %s1399_s28 = sshll.u32 %s1395_s29, 4  ;;  %s1400_s28 = int_to_ptr.hbm [resolvable:$true] %s1399_s28 }
  0x1e   : > { %v454_v43 = vsub.f32 %v431_v34, %v453_v36  ;;  %552 = vmatpush.msra.mxu3 %v1800_v9  ;;  %v490_v45 = vand.u32 4294901760, %v489_v38  ;;  %v687_v46 = vsub.f32 %v1829_v20, %v686_v30  ;;  %v658_v47 = vsub.f32 %v635_v35, %v1856_v37  ;;  %s1601_s15 = sshra.s32 %s1400_s28, 4  ;;  %s1602_s15 = int_to_ptr.hbm [resolvable:$true] %s1601_s15 }
  0x1f   : > { %575 = vmatpush.msrb.mxu0 %v476_v22  ;;  %479 = vmatpush.msra.mxu1 %v478_v39  ;;  %v698_v48 = vand.u32 4294901760, %v1850_v31  ;;  %v682_v50 = vand.u32 4294901760, %v681_v42  ;;  %v496_v51 = vand.u32 4294901760, %v495_v41  ;;  %v693_v52 = vsub.f32 %v1843_v25, %v692_v44  ;;  %v1579_v39 = vld [vmem:[%s1984_s6] ss:$0 sm:$0xff]  ;;  %s1603_s16 = scalar_lea.hbm %s1602_s15, 8  ;;  %p1608_p1 = scmp.lt.s32.totalorder %s1602_s15, %s1987_s9 }
  0x20   : > { %526 = vmatpush.msra.mxu2 %v1821_v18  ;;  %v455_v49 = vand.u32 4294901760, %v454_v43  ;;  %v659_v53 = vand.u32 4294901760, %v658_v47  ;;  %v688_v55 = vand.u32 4294901760, %v687_v46  ;;  %v846_v63 = vand.u32 4294901760, %v826_v62  ;;  %p1604_p12 = scmp.ne.s32.totalorder %s1602_s15, %s1603_s16  ;;  %p1609_p2 = scmp.lt.s32.totalorder %s1607_s24, %s1603_s16 }
  0x21   : > { %529 = vmatmul.f32.vlgmr.msra.gmra.mxu2 %v454_v43  ;;  %579 = vmatpush.msrb.mxu0 %v482_v23  ;;  %v699_v57 = vsub.f32 %v1850_v31, %v698_v48  ;;  %v694_v59 = vand.u32 4294901760, %v693_v52  ;;  %v848_v2 = vand.u32 4294901760, %v825_v0  ;;  %v1667_v27 = vmov 0.0  }
  0x22   : > { %485 = vmatpush.msra.mxu1 %v484_v40  ;;  %650 = vmatpush.msrb.mxu2 %v1803_v10  ;;  %v456_v54 = vsub.f32 %v454_v43, %v455_v49  ;;  %v660_v56 = vsub.f32 %v658_v47, %v659_v53  ;;  %v876_v1 = vsub.f32 %v826_v62, %v846_v63  ;;  %vm620_vm2 = vcmask 7168   ;;  %p1605_p13 = pnand %p1604_p12, %p1760_p4  ;;  %p1610_p3 = por %p1609_p2, %p1608_p1 }
  0x23   : > { %556 = vmatmul.f32.vlgmr.msra.gmra.mxu3 %v455_v49  ;;  %583 = vmatpush.msrb.mxu0 %v488_v24  ;;  %v700_v61 = vand.u32 4294901760, %v699_v57  ;;  %623 = vst.msk [vmem:[#allocation5] sm:$0xff] %vm618_vm1, %v1667_v27  ;;  %vm1174_vm3 = vcmask 64512  }
  0x24   : > { %491 = vmatpush.msra.mxu1 %v490_v45  ;;  %652 = vmatpush.msrb.mxu2 %v1805_v11  ;;  %v457_v58 = vand.u32 4294901760, %v456_v54  ;;  %v661_v60 = vand.u32 4294901760, %v660_v56  ;;  %622 = vst.msk [vmem:[#allocation4] sm:$0xff] %vm620_vm2, %v1667_v27  ;;  %p1606_p0 = pneg %p1605_p13 }
  0x25   : > { %683 = vmatpush.msrb.mxu3 %v682_v50  ;;  %587 = vmatpush.msrb.mxu0 %v494_v28 }
  0x26   : > { %497 = vmatpush.msra.mxu1 %v496_v51  ;;  %654 = vmatpush.msrb.mxu2 %v1818_v17  ;;  %p1611_p5 = pnand %p1610_p3, %p1606_p0 }
  0x27   : > { %458 = vmatmul.f32.vlgmr.msra.gmra.mxu0 %v457_v58  ;;  %499 = vmatmul.f32.vlgmr.msra.gmra.mxu1 %v453_v36 }
  0x28   : > { %606 = vmatpush.msrb.mxu1 %v1785_v3  ;;  %689 = vmatpush.msrb.mxu3 %v688_v55  ;;  %v824_v3 = vld [vmem:[%s1985_s7 + $0x8] sm:$0xff] }
  0x29   : > { %656 = vmatpush.msrb.mxu2 %v1831_v21  ;;  %721 = vmatpush.msra.mxu0 %v1826_v19  ;;  %v850_v6 = vand.u32 4294901760, %v824_v3 }
  0x2a   : > { %608 = vmatpush.msrb.mxu1 %v1787_v4  ;;  %695 = vmatpush.msrb.mxu3 %v694_v59  ;;  %v877_v4 = vand.u32 4294901760, %v876_v1 }
  0x2b   : > { %662 = vmatmul.f32.vlgmr.msrb.gmra.mxu2 %v661_v60  ;;  %724 = vmatpush.msra.mxu0 %v1829_v20 }
  0x2c   : > { %610 = vmatpush.msrb.mxu1 %v1789_v5  ;;  %701 = vmatpush.msrb.mxu3 %v700_v61  ;;  %v882_v5 = vsub.f32 %v825_v0, %v848_v2  ;;  %v878_v8 = vsub.f32 %v876_v1, %v877_v4 }
  0x2d   : > { %779 = vmatpush.msra.mxu2 %v680_v29  ;;  %703 = vmatmul.f32.vlgmr.msrb.gmra.mxu3 %v1856_v37 }
  0x2e   : > { %612 = vmatpush.msrb.mxu1 %v1800_v9  ;;  %810 = vmatpush.msra.mxu3 %v1803_v10  ;;  %v883_v9 = vand.u32 4294901760, %v882_v5  ;;  %v879_v13 = vand.u32 4294901760, %v878_v8 }
  0x2f   : > { %589 = vmatmul.f32.vlgmr.msrb.gmra.mxu0 %v453_v36  ;;  %783 = vmatpush.msra.mxu2 %v686_v30  ;;  %v1578_v30 = vld [vmem:[%s1982_s4] ss:$0 sm:$0xff] }
  0x30   : > { %614 = vmatmul.f32.vlgmr.msrb.gmra.mxu1 %v453_v36  ;;  %812 = vmatpush.msra.mxu3 %v1805_v11  ;;  %v884_v14 = vsub.f32 %v882_v5, %v883_v9 }
  0x31   : > { %750 = vmatpush.msra.mxu1 %v1803_v10  ;;  %787 = vmatpush.msra.mxu2 %v692_v44  ;;  %v888_v10 = vsub.f32 %v824_v3, %v850_v6 }
  0x32   : > { %727 = vmatpush.msra.mxu0 %v1843_v25  ;;  %814 = vmatpush.msra.mxu3 %v1818_v17  ;;  %v885_v18 = vand.u32 4294901760, %v884_v14 }
  0x33   : > { %752 = vmatpush.msra.mxu1 %v1805_v11  ;;  %791 = vmatpush.msra.mxu2 %v698_v48  ;;  %v852_v11 = vand.u32 4294901760, %v823_v7  ;;  %v889_v15 = vand.u32 4294901760, %v888_v10 }
  0x34   : > { %793 = vmatmul.f32.vlgmr.msra.gmra.mxu2 %v1856_v37  ;;  %730 = vmatpush.msra.mxu0 %v1850_v31 }
  0x35   : > { %754 = vmatpush.msra.mxu1 %v1818_v17  ;;  %816 = vmatpush.msra.mxu3 %v1831_v21  ;;  %v894_v16 = vsub.f32 %v823_v7, %v852_v11  ;;  %v832_v17 = vsel %vm429_vm0, %v822_v12, 0  ;;  %v890_v19 = vsub.f32 %v888_v10, %v889_v15 }
  0x36   : > { %818 = vmatmul.f32.vlgmr.msra.gmra.mxu3 %v1856_v37  ;;  %847 = vmatpush.msrb.mxu0 %v846_v63 }
  0x37   : > { %733 = vmatmul.f32.vlgmr.msra.gmra.mxu0 %v658_v47  ;;  %756 = vmatpush.msra.mxu1 %v1831_v21  ;;  %v895_v20 = vand.u32 4294901760, %v894_v16  ;;  %v854_v21 = vand.u32 4294901760, %v832_v17  ;;  %v891_v22 = vand.u32 4294901760, %v890_v19 }
  0x38   : > { %760 = vmatmul.f32.vlgmr.msra.gmra.mxu1 %v659_v53  ;;  %947 = vmatpush.msrb.mxu3 %v846_v63 }
  0x39   : > { %849 = vmatpush.msrb.mxu0 %v848_v2  ;;  %918 = vmatpush.msrb.mxu2 %v876_v1  ;;  %v896_v23 = vsub.f32 %v894_v16, %v895_v20  ;;  %v855_v24 = vsub.f32 %v832_v17, %v854_v21 }
  0x3a   : > { %949 = vmatpush.msrb.mxu3 %v848_v2  ;;  %880 = vmatpush.msrb.mxu1 %v879_v13 }
  0x3b   : > { %851 = vmatpush.msrb.mxu0 %v850_v6  ;;  %921 = vmatpush.msrb.mxu2 %v882_v5  ;;  %v897_v25 = vand.u32 4294901760, %v896_v23  ;;  %v856_v26 = vand.u32 4294901760, %v855_v24  ;;  %v1580_v5 = vld [vmem:[%s1986_s8] ss:$0 sm:$0xff]  ;;  %v1668_v23 = vmov -inf  }
  0x3c   : > { %951 = vmatpush.msrb.mxu3 %v850_v6  ;;  %886 = vmatpush.msrb.mxu1 %v885_v18  ;;  %621 = vst.msk [vmem:[#allocation3] sm:$0xff] %vm620_vm2, %v1668_v23 }
  0x3d   : > { %853 = vmatpush.msrb.mxu0 %v852_v11  ;;  %924 = vmatpush.msrb.mxu2 %v888_v10  ;;  %v857_v28 = vsub.f32 %v855_v24, %v856_v26 }
  0x3e   : > { %953 = vmatpush.msrb.mxu3 %v852_v11  ;;  %892 = vmatpush.msrb.mxu1 %v891_v22 }
  0x3f   : > { %976 = vmatpush.msra.mxu0 %v877_v4  ;;  %927 = vmatpush.msrb.mxu2 %v894_v16  ;;  %v858_v29 = vand.u32 4294901760, %v857_v28 }
  0x40   : > { %930 = vmatmul.f32.vlgmr.msrb.gmra.mxu2 %v855_v24  ;;  %898 = vmatpush.msrb.mxu1 %v897_v25 }
  0x41   : > { %980 = vmatpush.msra.mxu0 %v883_v9  ;;  %957 = vmatmul.f32.vlgmr.msrb.gmra.mxu3 %v856_v26 }
  0x42   : > { %900 = vmatmul.f32.vlgmr.msrb.gmra.mxu1 %v854_v21  ;;  %859 = vmatmul.f32.vlgmr.msrb.gmra.mxu0 %v858_v29 }
  0x43   : > { %984 = vmatpush.msra.mxu0 %v889_v15  ;;  %1007 = vmatpush.msra.mxu1 %v846_v63  ;;  %v1173_v27 = vld [vmem:[#allocation3] sm:$0xff] }
  0x45   : > { %988 = vmatpush.msra.mxu0 %v895_v20  ;;  %1009 = vmatpush.msra.mxu1 %v848_v2 }
  0x47   : > { %1011 = vmatpush.msra.mxu1 %v850_v6 }
  0x49   : > { %1013 = vmatpush.msra.mxu1 %v852_v11 }
  0x4a   : > { %1015 = vmatmul.f32.vlgmr.msra.gmra.mxu1 %v854_v21  ;;  %990 = vmatmul.f32.vlgmr.msra.gmra.mxu0 %v854_v21 }
  0xa4   : > { %v459_v31 = vpop.f32.mrf.mxu0  ;;  %v500_v32 = vpop.f32.mrf.mxu1 }
  0xa5   : > { %v460_v33 = vadd.f32 %v1578_v30, %v459_v31  ;;  %v530_v34 = vpop.f32.mrf.mxu2 }
  0xa6   : > { %v557_v35 = vpop.f32.mrf.mxu3 }
  0xa7   : > { %v501_v36 = vadd.f32 %v500_v32, %v460_v33 }
  0xa9   : > { %v531_v37 = vadd.f32 %v530_v34, %v501_v36 }
  0xab   : > { %v558_v38 = vadd.f32 %v557_v35, %v531_v37  ;;  %v1669_v37 = vmov 0  }
  0xac   : > { %v590_v40 = vpop.f32.mrf.mxu0  ;;  %1575 = vset.pattern.permute.xlu0 %v1669_v37  ;;  %1577 = vset.pattern.permute.xlu2 %v1669_v37 }
  0xad   : > { %v591_v41 = vadd.f32 %v590_v40, %v558_v38  ;;  %v615_v42 = vpop.f32.mrf.mxu1  ;;  %1576 = vset.pattern.permute.xlu1 %v1669_v37 }
  0xae   : > { %v663_v43 = vpop.f32.mrf.mxu2 }
  0xaf   : > { %v616_v44 = vadd.f32 %v615_v42, %v591_v41  ;;  %v664_v45 = vadd.f32 %v1579_v39, %v663_v43 }
  0xb0   : > { %v704_v46 = vpop.f32.mrf.mxu3 }
  0xb1   : > { %619 = vst.msk [vmem:[#allocation2] sm:$0xff] %vm618_vm1, %v616_v44  ;;  %v705_v47 = vadd.f32 %v704_v46, %v664_v45 }
  0xb4   : > { %v734_v48 = vpop.f32.mrf.mxu0 }
  0xb5   : > { %v735_v49 = vadd.f32 %v734_v48, %v705_v47  ;;  %v761_v50 = vpop.f32.mrf.mxu1 }
  0xb7   : > { %v762_v51 = vadd.f32 %v761_v50, %v735_v49  ;;  %v794_v52 = vpop.f32.mrf.mxu2 }
  0xb8   : > { %v1019_v53 = vld [vmem:[#allocation2] sm:$0xff] }
  0xb9   : > { %v795_v54 = vadd.f32 %v794_v52, %v762_v51  ;;  %v819_v55 = vpop.f32.mrf.mxu3  ;;  %v1022_v56 = vsel %vm618_vm1, %v1019_v53, 0 }
  0xba   : > { %v1044_v57 = vand.u32 4294901760, %v1022_v56 }
  0xbb   : > { %v820_v58 = vadd.f32 %v819_v55, %v795_v54  ;;  %v1190_v54 = vld [vmem:[#allocation4] sm:$0xff] }
  0xbc   : > { %v1045_v59 = vsub.f32 %v1022_v56, %v1044_v57 }
  0xbd   : > { %v1025_v60 = vsel %vm618_vm1, %v820_v58, 0 }
  0xbe   : > { %v1042_v61 = vand.u32 4294901760, %v1025_v60  ;;  %v1046_v62 = vand.u32 4294901760, %v1045_v59 }
  0xbf   : > { %v860_v6 = vpop.f32.mrf.mxu0  ;;  %v901_v8 = vpop.f32.mrf.mxu1 }
  0xc0   : > { %v1069_v63 = vsub.f32 %v1025_v60, %v1042_v61  ;;  %1043 = vmatpush.xpose.msra.mxu2 %v1042_v61  ;;  %1119 = vmatpush.xpose.msrb.mxu1 %v1042_v61  ;;  %v1047_v0 = vsub.f32 %v1045_v59, %v1046_v62  ;;  %v861_v7 = vadd.f32 %v1580_v5, %v860_v6 }
  0xc2   : > { %1096 = vmatpush.xpose.msrb.mxu0 %v1069_v63  ;;  %v1048_v1 = vand.u32 4294901760, %v1047_v0  ;;  %v1070_v2 = vand.u32 4294901760, %v1069_v63  ;;  %v902_v9 = vadd.f32 %v901_v8, %v861_v7 }
  0xc3   : > { %1123 = vmatmul.f32.vlgmr.msrb.gmra.mxu1 %v1046_v62  ;;  %v931_v10 = vpop.f32.mrf.mxu2 }
  0xc4   : > { %1049 = vmatmul.f32.vlgmr.msra.gmra.mxu2 %v1048_v1  ;;  %v1071_v3 = vsub.f32 %v1069_v63, %v1070_v2  ;;  %v932_v11 = vadd.f32 %v931_v10, %v902_v9  ;;  %v958_v12 = vpop.f32.mrf.mxu3 }
  0xc5   : > { %1145 = vmatpush.xpose.msrb.mxu2 %v1070_v2  ;;  %1099 = vmatmul.f32.vlgmr.msrb.gmra.mxu0 %v1045_v59  ;;  %v1198_v2 = vld [vmem:[#allocation5] sm:$0xff] }
  0xc6   : > { %v1072_v4 = vand.u32 4294901760, %v1071_v3  ;;  %v959_v13 = vadd.f32 %v958_v12, %v932_v11 }
  0xc7   : > { %v991_v14 = vpop.f32.mrf.mxu0  ;;  %v1016_v16 = vpop.f32.mrf.mxu1 }
  0xc8   : > { %1073 = vmatpush.xpose.msra.mxu3 %v1072_v4  ;;  %v992_v15 = vadd.f32 %v991_v14, %v959_v13 }
  0xca   : > { %v1017_v17 = vadd.f32 %v1016_v16, %v992_v15 }
  0xcb   : > { %1075 = vmatmul.f32.vlgmr.msra.gmra.mxu3 %v1044_v57 }
  0xcc   : > { %1167 = vmatpush.xpose.msrb.mxu3 %v1042_v61  ;;  %1147 = vmatmul.f32.vlgmr.msrb.gmra.mxu2 %v1044_v57  ;;  %v1223_v18 = vand.u32 4294901760, %v1017_v17 }
  0xce   : > { %v1250_v19 = vsub.f32 %v1017_v17, %v1223_v18  ;;  %1224 = vmatpush.msra.mxu0 %v1223_v18 }
  0xd0   : > { %1300 = vmatpush.msra.mxu3 %v1223_v18  ;;  %v1251_v20 = vand.u32 4294901760, %v1250_v19  ;;  %1277 = vmatpush.msra.mxu2 %v1250_v19 }
  0xd2   : > { %v1252_v21 = vsub.f32 %v1250_v19, %v1251_v20  ;;  %1326 = vmatpush.msrb.mxu0 %v1251_v20 }
  0xd3   : > { %1169 = vmatmul.f32.vlgmr.msrb.gmra.mxu3 %v1044_v57 }
  0xd4   : > { %v1253_v22 = vand.u32 4294901760, %v1252_v21 }
  0xd6   : > { %1254 = vmatpush.msra.mxu1 %v1253_v22 }
  0xd8   : > { %1348 = vmatpush.msrb.mxu1 %v1223_v18 }
 0x140   : > { %v1124_v30 = vpop.f32.mrf.mxu1 }
 0x142   : > { %v1100_v28 = vpop.f32.mrf.mxu0 }
 0x147   : > { %v1050_v24 = vpop.f32.mrf.mxu2 }
 0x14e   : > { %v1076_v25 = vpop.f32.mrf.mxu3 }
 0x14f   : > { %v1077_v26 = vadd.f32 %v1076_v25, %v1050_v24  ;;  %v1148_v32 = vpop.f32.mrf.mxu2 }
 0x151   : > { %v1101_v29 = vadd.f32 %v1100_v28, %v1077_v26 }
 0x153   : > { %v1125_v31 = vadd.f32 %v1124_v30, %v1101_v29 }
 0x155   : > { %v1149_v33 = vadd.f32 %v1148_v32, %v1125_v31 }
 0x156   : > { %v1170_v34 = vpop.f32.mrf.mxu3 }
 0x157   : > { %v1171_v35 = vadd.f32 %v1170_v34, %v1149_v33 }
 0x159   : > { %v1175_v36 = vsel %vm1174_vm3, %v1171_v35, -inf }
 0x15a   : > { %1176 = vmax.xlane.f32.xlu0 %v1175_v36 }
 0x1cd   : > { %v1177_v38 = vpop.xlane.xlu0 %1176 }
 0x1ce   : > { %v1178_v39 = vmax.f32 %v1173_v27, %v1177_v38 }
 0x1d0   : > { %v1179_v40 = vsub.f32 %v1173_v27, %v1178_v39  ;;  %1356 = vst.msk [vmem:[#allocation3] sm:$0xff] %vm620_vm2, %v1178_v39  ;;  %1184 = vperm.xlu0 %1575, %v1178_v39  }
 0x1d2   : > { %v1180_v41 = vmul.f32 1.442695, %v1179_v40 }
 0x1d4   : > { %1581 = vpow2.f32 %v1180_v41 }
 0x1da   : > { %v1582_v42 = vpop.eup %1581 }
 0x1db   : > { %1201 = vperm.xlu2 %1577, %v1582_v42   ;;  %v1191_v55 = vmul.f32 %v1582_v42, %v1190_v54 }
 0x235   : > { %v1202_v3 = vpop.permute.xlu2 %1201 }
 0x236   : > { %v1204_v7 = vmul.f32 %v1202_v3, %v1198_v2 }
 0x242   : > { %v1185_v43 = vpop.permute.xlu0 %1184 }
 0x243   : > { %v1187_v44 = vsub.f32 %v1171_v35, %v1185_v43 }
 0x245   : > { %v1188_v45 = vmul.f32 1.442695, %v1187_v44 }
 0x247   : > { %1583 = vpow2.f32 %v1188_v45 }
 0x24d   : > { %v1584_v46 = vpop.eup %1583 }
 0x24e   : > { %v1192_v47 = vsel %vm1174_vm3, %v1584_v46, 0.0  ;;  %v1206_v48 = vsel %vm1174_vm3, %v1584_v46, 0 }
 0x24f   : > { %1193 = vadd.xlane.f32.xlu1 %v1192_v47  ;;  %v1225_v49 = vand.u32 4294901760, %v1206_v48 }
 0x251   : > { %1256 = vmatmul.f32.vlgmr.msra.gmra.mxu1 %v1225_v49  ;;  %v1226_v50 = vsub.f32 %v1206_v48, %v1225_v49 }
 0x253   : > { %1280 = vmatmul.f32.vlgmr.msra.gmra.mxu2 %v1226_v50  ;;  %v1227_v51 = vand.u32 4294901760, %v1226_v50 }
 0x255   : > { %1304 = vmatmul.f32.vlgmr.msra.gmra.mxu3 %v1227_v51  ;;  %v1228_v52 = vsub.f32 %v1226_v50, %v1227_v51 }
 0x257   : > { %v1229_v53 = vand.u32 4294901760, %v1228_v52 }
 0x259   : > { %1230 = vmatmul.f32.vlgmr.msra.gmra.mxu0 %v1229_v53  ;;  %1350 = vmatmul.f32.vlgmr.msrb.gmra.mxu1 %v1225_v49 }
 0x261   : > { %1328 = vmatmul.f32.vlgmr.msrb.gmra.mxu0 %v1225_v49 }
 0x2c2   : > { %v1194_v56 = vpop.xlane.xlu1 %1193 }
 0x2c3   : > { %v1195_v57 = vadd.f32 %v1194_v56, %v1191_v55 }
 0x2c5   : > { %1197 = vst.msk [vmem:[#allocation4] sm:$0xff] %vm620_vm2, %v1195_v57 }
 0x2cc   : > { %v1361_v58 = vld [vmem:[#allocation4] sm:$0xff] }
 0x2cd   : > { %1364 = vperm.xlu1 %1576, %v1361_v58  }
 0x2ce   : > { %v1257_v59 = vpop.f32.mrf.mxu1 }
 0x2d6   : > { %v1231_v60 = vpop.f32.mrf.mxu0  ;;  %v1281_v62 = vpop.f32.mrf.mxu2 }
 0x2d7   : > { %v1258_v61 = vadd.f32 %v1257_v59, %v1231_v60  ;;  %v1351_v6 = vpop.f32.mrf.mxu1 }
 0x2d8   : > { %v1305_v0 = vpop.f32.mrf.mxu3 }
 0x2d9   : > { %v1282_v63 = vadd.f32 %v1281_v62, %v1258_v61 }
 0x2db   : > { %v1306_v1 = vadd.f32 %v1305_v0, %v1282_v63 }
 0x2de   : > { %v1329_v4 = vpop.f32.mrf.mxu0 }
 0x2df   : > { %v1330_v5 = vadd.f32 %v1329_v4, %v1306_v1 }
 0x2e1   : > { %v1352_v8 = vadd.f32 %v1351_v6, %v1330_v5 }
 0x2e3   : > { %v1354_v9 = vadd.f32 %v1352_v8, %v1204_v7 }
 0x2e5   : > { %1355 = vst.msk [vmem:[#allocation5] sm:$0xff] %vm618_vm1, %v1354_v9 }
 0x2ec   : > { %v1360_v21 = vld [vmem:[#allocation5] sm:$0xff] }
 0x33f   : > { %v1365_v10 = vpop.permute.xlu1 %1364 }
 0x340   : > { %1585 = vrcp.f32 %v1365_v10  ;;  %v1378_v14 = vand.u32 2147483648, %v1365_v10  ;;  %v1376_v16 = vand.u32 2147483647, %v1365_v10  ;;  %vm1372_vm5 = vweird.f32 %v1365_v10 }
 0x342   : > { %v1379_v18 = vor.u32 1.1754944e-38, %v1378_v14  ;;  %vm1377_vm7 = vcmp.eq.f32.partialorder %v1376_v16, 8.507059e+37 }
 0x346   : > { %v1586_v11 = vpop.eup %1585 }
 0x347   : > { %v1368_v12 = vmul.f32 %v1586_v11, %v1365_v10  ;;  %vm1373_vm4 = vweird.f32 %v1586_v11 }
 0x348   : > { %vm1374_vm6 = vmor %vm1372_vm5, %vm1373_vm4 }
 0x349   : > { %v1369_v13 = vsub.f32 1.0, %v1368_v12 }
 0x34b   : > { %v1370_v15 = vmul.f32 %v1586_v11, %v1369_v13 }
 0x34d   : > { %v1371_v17 = vadd.f32 %v1586_v11, %v1370_v15 }
 0x34f   : > { %v1375_v19 = vsel %vm1374_vm6, %v1586_v11, %v1371_v17 }
 0x350   : > { %v1380_v20 = vsel %vm1377_vm7, %v1379_v18, %v1375_v19 }
 0x351   : > { %v1381_v22 = vmul.f32 %v1380_v20, %v1360_v21 }
 0x353   : > { %1382 = vst.msk [vmem:[%s394_s26] sm:$0xff] %vm618_vm1, %v1381_v22 }
 0x354   : > { %1614 = shalt.err (!%p1611_p5)
}
 0x355   : > { %1517 = dma.vmem_to_hbm [thread:$0]  (%p1760_p4), %s1398_s27, 128, %s1400_s28, %s1384_s12  }
 0x356 PF: > { %p1523_p6 = scmp.ge.s32.totalorder %s1665_s14, 2  ;;  %s1411_s18 = sand.u32 1, %s1645_s30  }
 0x357   : > { %s1412_s26 = scalar_lea.sflag [#allocation7], %s1411_s18 }
 0x358   : > { %p1520_p7 = pnand %p1523_p6, %p1767_p8 }
 0x35a   : > { %p1521_p9 = pneg %p1520_p7 }
 0x35c   : > { %1640 = dma.done.wait (%p1521_p9), %s1412_s26, 128  }
 0x35d   : > { %1642 = vsyncadd (%p1521_p9), %s1412_s26, 4294967168  ;;  %s22_s14 = sadd.s32 1, %s1665_s14   ;;  %s1990_s30 = smov %s1649_s10 }
 0x35e   : > { %p19_p10 = scmp.ge.s32.totalorder %s22_s14, 4   ;;  %s1991_s10 = smov %s1653_s11 }
 0x35f   : > { %s1992_s11 = smov %s1773_s22  ;;  %s1993_s12 = smov %s1661_s13 }
 0x360   : > { %s1994_s13 = smov %s1996_s17  ;;  %21 = sbr.rel (!%p19_p10) target bundleno = 4 (0x4), region = 105 }
 0x365   :  { %1418 = vsyncpa [#allocation7], 1 }
 0x366   :  { %1420 = vsyncpa [#allocation7 + $0x1], 1 }

</bundles_post_ra>
